<compile_context>
chip_gen: v7x
topology: tpu7x:2x2x1
jax: 0.10.0
libtpu: 0.0.40
codegen_flags: <defaults>
</compile_context>

<pallas_src>
import math
import functools

import jax
import jax.numpy as jnp
from jax import lax
from jax.experimental import pallas as pl
from jax.experimental.pallas import tpu as pltpu


def _attention_kernel(x_ref, g_ref, be_ref,
                      wq_ref, bq_ref, wk_ref, bk_ref, wv_ref, bv_ref,
                      o_ref, acc_ref, *, num_heads, qk_head, v_head, ln_eps):
    # x_ref block: (S, q_dim) -- leading batch dim squeezed by BlockSpec(None,...)
    x = x_ref[...].astype(jnp.float32)

    # LayerNorm over the channel dim (nn.LayerNorm(q_dim), eps=1e-5), f32 stats.
    mean = jnp.mean(x, axis=-1, keepdims=True)
    var = jnp.mean(jnp.square(x - mean), axis=-1, keepdims=True)
    xn = (x - mean) * lax.rsqrt(var + ln_eps)
    xn = xn * g_ref[0].astype(jnp.float32) + be_ref[0].astype(jnp.float32)

    # Compute dtype for MXU operands follows the parameter dtype (bf16 params ->
    # bf16 matmuls with f32 accumulation; f32 params -> exact f32 path).
    cdt = wq_ref.dtype
    xn_c = xn.astype(cdt)

    # Q / K / V projections (x @ W + b), f32 accumulation. Weights are read in
    # their native dtype (no per-step astype copies of the resident weights).
    q = jnp.dot(xn_c, wq_ref[...], preferred_element_type=jnp.float32) \
        + bq_ref[0].astype(jnp.float32)
    k = jnp.dot(xn_c, wk_ref[...], preferred_element_type=jnp.float32) \
        + bk_ref[0].astype(jnp.float32)
    v = jnp.dot(xn_c, wv_ref[...], preferred_element_type=jnp.float32) \
        + bv_ref[0].astype(jnp.float32)

    scale = 1.0 / math.sqrt(qk_head)
    qc = (q * scale).astype(cdt)     # fold 1/sqrt(d) into q (cheaper than scaling scores)
    kc = k.astype(cdt)
    vc = v.astype(cdt)

    # Contract over the last dims of both operands: (S, d) x (S, d) -> (S, S),
    # i.e. q @ k^T without materializing a transpose.
    qk_dn = (((1,), (1,)), ((), ()))

    # TODO(synk): for large S / num_heads, tile queries (flash-style grid axis)
    # and/or batch heads in a single dot_general to better fill the MXU.
    for h in range(num_heads):
        qh = qc[:, h * qk_head:(h + 1) * qk_head]
        kh = kc[:, h * qk_head:(h + 1) * qk_head]
        vh = vc[:, h * v_head:(h + 1) * v_head]

        scores = lax.dot_general(qh, kh, qk_dn, preferred_element_type=jnp.float32)
        scores = scores - jnp.max(scores, axis=-1, keepdims=True)
        probs = jnp.exp(scores)
        inv_l = pl.reciprocal(jnp.sum(probs, axis=-1, keepdims=True), approx=True)
        probs = probs * inv_l
        # dropout is identity at inference; attention_mask / head_mask are None.

        ctx = jnp.dot(probs.astype(cdt), vh, preferred_element_type=jnp.float32)
        acc_ref[:, h * v_head:(h + 1) * v_head] = ctx

    # Single lane-dense store of the full (S, v_channels) context.
    o_ref[...] = acc_ref[...].astype(o_ref.dtype)


def perceiver_self_attention(hidden_states, params, *, num_heads, ln_eps=1e-5):
    """hidden_states: (B, S, q_dim) -> context_layer: (B, S, v_channels)."""
    B, S, q_dim = hidden_states.shape
    wq, bq = params["wq"], params["bq"]
    wk, bk = params["wk"], params["bk"]
    wv, bv = params["wv"], params["bv"]
    gamma, beta = params["ln_gamma"], params["ln_beta"]

    qk_channels = wq.shape[1]
    v_channels = wv.shape[1]
    assert qk_channels % num_heads == 0 and v_channels % num_heads == 0
    qk_head = qk_channels // num_heads
    v_head = v_channels // num_heads

    kernel = functools.partial(
        _attention_kernel,
        num_heads=num_heads, qk_head=qk_head, v_head=v_head, ln_eps=ln_eps)

    # Rough per-grid-step VMEM working-set estimate (bytes) -> scoped VMEM limit.
    in_sz = jnp.dtype(hidden_states.dtype).itemsize
    w_sz = jnp.dtype(wq.dtype).itemsize
    est = (
        2 * S * q_dim * in_sz                                   # input block (double-buffered)
        + 2 * S * v_channels * in_sz                            # output block (double-buffered)
        + 2 * (q_dim + 1) * (2 * qk_channels + v_channels) * w_sz  # weights + biases
        + S * v_channels * 4                                    # f32 acc scratch
        + 8 * S * (2 * qk_channels + v_channels)                # q/k/v (f32 + compute-dtype)
        + 2 * S * S * 4                                         # one head's scores/probs
    )
    vmem_limit = int(min(max(32 << 20, 2 * est), 100 << 20))

    full2d = lambda shape: pl.BlockSpec(shape, lambda b: (0, 0))

    return pl.pallas_call(
        kernel,
        out_shape=jax.ShapeDtypeStruct((B, S, v_channels), hidden_states.dtype),
        grid_spec=pltpu.PrefetchScalarGridSpec(
            num_scalar_prefetch=0,
            grid=(B,),
            in_specs=[
                pl.BlockSpec((None, S, q_dim), lambda b: (b, 0, 0)),  # hidden_states (batch squeezed)
                full2d((1, q_dim)),                                   # ln gamma
                full2d((1, q_dim)),                                   # ln beta
                full2d((q_dim, qk_channels)),                         # Wq
                full2d((1, qk_channels)),                             # bq
                full2d((q_dim, qk_channels)),                         # Wk
                full2d((1, qk_channels)),                             # bk
                full2d((q_dim, v_channels)),                          # Wv
                full2d((1, v_channels)),                              # bv
            ],
            out_specs=pl.BlockSpec((None, S, v_channels), lambda b: (b, 0, 0)),
            scratch_shapes=[pltpu.VMEM((S, v_channels), jnp.float32)],
        ),
        compiler_params=pltpu.CompilerParams(
            dimension_semantics=("parallel",),
            vmem_limit_bytes=vmem_limit),
    )(hidden_states, gamma, beta, wq, bq, wk, bk, wv, bv)


def _reference(hidden_states, params, *, num_heads, ln_eps=1e-5):
    """Pure-JAX reference mirroring the PyTorch forward (self-attention path)."""
    x = hidden_states.astype(jnp.float32)
    mean = jnp.mean(x, axis=-1, keepdims=True)
    var = jnp.mean((x - mean) ** 2, axis=-1, keepdims=True)
    xn = (x - mean) / jnp.sqrt(var + ln_eps) * params["ln_gamma"][0] + params["ln_beta"][0]

    wq = params["wq"].astype(jnp.float32); wk = params["wk"].astype(jnp.float32)
    wv = params["wv"].astype(jnp.float32)
    q = xn @ wq + params["bq"][0]
    k = xn @ wk + params["bk"][0]
    v = xn @ wv + params["bv"][0]

    B, S, _ = x.shape
    qk_head = params["wq"].shape[1] // num_heads
    v_head = params["wv"].shape[1] // num_heads

    def heads(t, d):
        return t.reshape(B, S, num_heads, d).transpose(0, 2, 1, 3)

    qh, kh, vh = heads(q, qk_head), heads(k, qk_head), heads(v, v_head)
    scores = jnp.einsum("bhsd,bhtd->bhst", qh, kh) / math.sqrt(qk_head)
    probs = jax.nn.softmax(scores, axis=-1)
    ctx = jnp.einsum("bhst,bhtd->bhsd", probs, vh)
    ctx = ctx.transpose(0, 2, 1, 3).reshape(B, S, num_heads * v_head)
    return ctx.astype(hidden_states.dtype)


if __name__ == "__main__":
    # Small config: batch=2, seq=8, q_dim=32, num_heads=4 (qk_channels=v_channels=32)
    B, S, q_dim, num_heads = 2, 8, 32, 4
    qk_channels = q_dim          # module default when qk_channels is None
    v_channels = qk_channels     # module default when v_channels is None

    key = jax.random.PRNGKey(0)
    ks = jax.random.split(key, 8)
    scale = 0.05
    params = {
        "ln_gamma": jnp.ones((1, q_dim), jnp.float32),
        "ln_beta": jnp.zeros((1, q_dim), jnp.float32),
        "wq": scale * jax.random.normal(ks[0], (q_dim, qk_channels), jnp.float32),
        "bq": scale * jax.random.normal(ks[1], (1, qk_channels), jnp.float32),
        "wk": scale * jax.random.normal(ks[2], (q_dim, qk_channels), jnp.float32),
        "bk": scale * jax.random.normal(ks[3], (1, qk_channels), jnp.float32),
        "wv": scale * jax.random.normal(ks[4], (q_dim, v_channels), jnp.float32),
        "bv": scale * jax.random.normal(ks[5], (1, v_channels), jnp.float32),
    }
    hidden_states = jax.random.normal(ks[6], (B, S, q_dim), jnp.float32)

    out = perceiver_self_attention(hidden_states, params, num_heads=num_heads)
    out = jax.block_until_ready(out)

    ref = _reference(hidden_states, params, num_heads=num_heads)
    assert out.shape == (B, S, v_channels)
    # Tolerance absorbs the EUP approx-reciprocal in the softmax normalization.
    assert jnp.allclose(out, ref, atol=1e-3, rtol=1e-3), "mismatch vs reference"

    print("KERNEL_OK")
</pallas_src>

<mosaic_0001>
module attributes {stable_mosaic.version = 11 : i64} {
  func.func @_attention_kernel(%arg0: i32, %arg1: memref<1x8x32xf32, #tpu.memory_space<vmem>>, %arg2: memref<1x32xf32, #tpu.memory_space<vmem>>, %arg3: memref<1x32xf32, #tpu.memory_space<vmem>>, %arg4: memref<32x32xf32, #tpu.memory_space<vmem>>, %arg5: memref<1x32xf32, #tpu.memory_space<vmem>>, %arg6: memref<32x32xf32, #tpu.memory_space<vmem>>, %arg7: memref<1x32xf32, #tpu.memory_space<vmem>>, %arg8: memref<32x32xf32, #tpu.memory_space<vmem>>, %arg9: memref<1x32xf32, #tpu.memory_space<vmem>>, %arg10: memref<1x8x32xf32, #tpu.memory_space<vmem>>, %arg11: memref<8x32xf32, #tpu.memory_space<vmem>>) attributes {dimension_semantics = [#tpu.dimension_semantics<parallel>], iteration_bounds = array<i64: 2>, scalar_prefetch = 0 : i64, scratch_operands = 1 : i64, tpu.core_type = #tpu.core_type<tc>, window_params = [{transform_indices = @transform_0, window_bounds = array<i64: 1, 8, 32>}, {pipeline_mode = #tpu.pipeline_mode<synchronous>, transform_indices = @transform_1, window_bounds = array<i64: 1, 32>}, {pipeline_mode = #tpu.pipeline_mode<synchronous>, transform_indices = @transform_2, window_bounds = array<i64: 1, 32>}, {pipeline_mode = #tpu.pipeline_mode<synchronous>, transform_indices = @transform_3, window_bounds = array<i64: 32, 32>}, {pipeline_mode = #tpu.pipeline_mode<synchronous>, transform_indices = @transform_4, window_bounds = array<i64: 1, 32>}, {pipeline_mode = #tpu.pipeline_mode<synchronous>, transform_indices = @transform_5, window_bounds = array<i64: 32, 32>}, {pipeline_mode = #tpu.pipeline_mode<synchronous>, transform_indices = @transform_6, window_bounds = array<i64: 1, 32>}, {pipeline_mode = #tpu.pipeline_mode<synchronous>, transform_indices = @transform_7, window_bounds = array<i64: 32, 32>}, {pipeline_mode = #tpu.pipeline_mode<synchronous>, transform_indices = @transform_8, window_bounds = array<i64: 1, 32>}, {transform_indices = @transform_9, window_bounds = array<i64: 1, 8, 32>}]} {
    %c0 = arith.constant 0 : index
    %c0_0 = arith.constant 0 : index
    %c0_1 = arith.constant 0 : index
    %0 = vector.load %arg1[%c0, %c0_0, %c0_1] : memref<1x8x32xf32, #tpu.memory_space<vmem>>, vector<1x8x32xf32>
    %1 = vector.shape_cast %0 : vector<1x8x32xf32> to vector<8x32xf32>
    %cst = arith.constant dense<0.000000e+00> : vector<8xf32>
    %2 = vector.multi_reduction <add>, %1, %cst [1] : vector<8x32xf32> to vector<8xf32>
    %3 = vector.shape_cast %2 : vector<8xf32> to vector<8x1xf32>
    %cst_2 = arith.constant 3.200000e+01 : f32
    %4 = vector.broadcast %cst_2 : f32 to vector<8x1xf32>
    %5 = arith.divf %3, %4 : vector<8x1xf32>
    %6 = vector.broadcast %5 : vector<8x1xf32> to vector<8x32xf32>
    %7 = arith.subf %1, %6 : vector<8x32xf32>
    %8 = arith.mulf %7, %7 : vector<8x32xf32>
    %cst_3 = arith.constant dense<0.000000e+00> : vector<8xf32>
    %9 = vector.multi_reduction <add>, %8, %cst_3 [1] : vector<8x32xf32> to vector<8xf32>
    %10 = vector.shape_cast %9 : vector<8xf32> to vector<8x1xf32>
    %cst_4 = arith.constant 3.200000e+01 : f32
    %11 = vector.broadcast %cst_4 : f32 to vector<8x1xf32>
    %12 = arith.divf %10, %11 : vector<8x1xf32>
    %13 = vector.broadcast %5 : vector<8x1xf32> to vector<8x32xf32>
    %14 = arith.subf %1, %13 : vector<8x32xf32>
    %cst_5 = arith.constant 9.99999974E-6 : f32
    %15 = vector.broadcast %cst_5 : f32 to vector<8x1xf32>
    %16 = arith.addf %12, %15 : vector<8x1xf32>
    %17 = math.rsqrt %16 : vector<8x1xf32>
    %18 = vector.broadcast %17 : vector<8x1xf32> to vector<8x32xf32>
    %19 = arith.mulf %14, %18 : vector<8x32xf32>
    %c0_6 = arith.constant 0 : index
    %c0_7 = arith.constant 0 : index
    %20 = vector.load %arg2[%c0_6, %c0_7] : memref<1x32xf32, #tpu.memory_space<vmem>>, vector<1x32xf32>
    %21 = vector.shape_cast %20 : vector<1x32xf32> to vector<32xf32>
    %22 = vector.shape_cast %21 : vector<32xf32> to vector<1x32xf32>
    %23 = vector.broadcast %22 : vector<1x32xf32> to vector<8x32xf32>
    %24 = arith.mulf %19, %23 : vector<8x32xf32>
    %c0_8 = arith.constant 0 : index
    %c0_9 = arith.constant 0 : index
    %25 = vector.load %arg3[%c0_8, %c0_9] : memref<1x32xf32, #tpu.memory_space<vmem>>, vector<1x32xf32>
    %26 = vector.shape_cast %25 : vector<1x32xf32> to vector<32xf32>
    %27 = vector.shape_cast %26 : vector<32xf32> to vector<1x32xf32>
    %28 = vector.broadcast %27 : vector<1x32xf32> to vector<8x32xf32>
    %29 = arith.addf %24, %28 : vector<8x32xf32>
    %c0_10 = arith.constant 0 : index
    %c0_11 = arith.constant 0 : index
    %30 = vector.load %arg4[%c0_10, %c0_11] : memref<32x32xf32, #tpu.memory_space<vmem>>, vector<32x32xf32>
    %cst_12 = arith.constant dense<0.000000e+00> : vector<8x32xf32>
    %31 = tpu.matmul %29, %30, %cst_12 {dimension_numbers = #tpu.dot_dimension_numbers<[1], [0], [0], [1], [0, 0, 1, 1], [], []>} : vector<8x32xf32>, vector<32x32xf32>, vector<8x32xf32> -> vector<8x32xf32>
    %c0_13 = arith.constant 0 : index
    %c0_14 = arith.constant 0 : index
    %32 = vector.load %arg5[%c0_13, %c0_14] : memref<1x32xf32, #tpu.memory_space<vmem>>, vector<1x32xf32>
    %33 = vector.shape_cast %32 : vector<1x32xf32> to vector<32xf32>
    %34 = vector.shape_cast %33 : vector<32xf32> to vector<1x32xf32>
    %35 = vector.broadcast %34 : vector<1x32xf32> to vector<8x32xf32>
    %36 = arith.addf %31, %35 : vector<8x32xf32>
    %c0_15 = arith.constant 0 : index
    %c0_16 = arith.constant 0 : index
    %37 = vector.load %arg6[%c0_15, %c0_16] : memref<32x32xf32, #tpu.memory_space<vmem>>, vector<32x32xf32>
    %cst_17 = arith.constant dense<0.000000e+00> : vector<8x32xf32>
    %38 = tpu.matmul %29, %37, %cst_17 {dimension_numbers = #tpu.dot_dimension_numbers<[1], [0], [0], [1], [0, 0, 1, 1], [], []>} : vector<8x32xf32>, vector<32x32xf32>, vector<8x32xf32> -> vector<8x32xf32>
    %c0_18 = arith.constant 0 : index
    %c0_19 = arith.constant 0 : index
    %39 = vector.load %arg7[%c0_18, %c0_19] : memref<1x32xf32, #tpu.memory_space<vmem>>, vector<1x32xf32>
    %40 = vector.shape_cast %39 : vector<1x32xf32> to vector<32xf32>
    %41 = vector.shape_cast %40 : vector<32xf32> to vector<1x32xf32>
    %42 = vector.broadcast %41 : vector<1x32xf32> to vector<8x32xf32>
    %43 = arith.addf %38, %42 : vector<8x32xf32>
    %c0_20 = arith.constant 0 : index
    %c0_21 = arith.constant 0 : index
    %44 = vector.load %arg8[%c0_20, %c0_21] : memref<32x32xf32, #tpu.memory_space<vmem>>, vector<32x32xf32>
    %cst_22 = arith.constant dense<0.000000e+00> : vector<8x32xf32>
    %45 = tpu.matmul %29, %44, %cst_22 {dimension_numbers = #tpu.dot_dimension_numbers<[1], [0], [0], [1], [0, 0, 1, 1], [], []>} : vector<8x32xf32>, vector<32x32xf32>, vector<8x32xf32> -> vector<8x32xf32>
    %c0_23 = arith.constant 0 : index
    %c0_24 = arith.constant 0 : index
    %46 = vector.load %arg9[%c0_23, %c0_24] : memref<1x32xf32, #tpu.memory_space<vmem>>, vector<1x32xf32>
    %47 = vector.shape_cast %46 : vector<1x32xf32> to vector<32xf32>
    %48 = vector.shape_cast %47 : vector<32xf32> to vector<1x32xf32>
    %49 = vector.broadcast %48 : vector<1x32xf32> to vector<8x32xf32>
    %50 = arith.addf %45, %49 : vector<8x32xf32>
    %cst_25 = arith.constant 0.353553385 : f32
    %51 = vector.broadcast %cst_25 : f32 to vector<8x32xf32>
    %52 = arith.mulf %36, %51 : vector<8x32xf32>
    %53 = vector.extract_strided_slice %52 {offsets = [0, 0], sizes = [8, 8], strides = [1, 1]} : vector<8x32xf32> to vector<8x8xf32>
    %54 = vector.extract_strided_slice %43 {offsets = [0, 0], sizes = [8, 8], strides = [1, 1]} : vector<8x32xf32> to vector<8x8xf32>
    %55 = vector.extract_strided_slice %50 {offsets = [0, 0], sizes = [8, 8], strides = [1, 1]} : vector<8x32xf32> to vector<8x8xf32>
    %cst_26 = arith.constant dense<0.000000e+00> : vector<8x8xf32>
    %56 = tpu.matmul %53, %54, %cst_26 {dimension_numbers = #tpu.dot_dimension_numbers<[1], [1], [0], [0], [0, 0, 1, 0], [], []>} : vector<8x8xf32>, vector<8x8xf32>, vector<8x8xf32> -> vector<8x8xf32>
    %cst_27 = arith.constant dense<0xFF800000> : vector<8xf32>
    %57 = vector.multi_reduction <maximumf>, %56, %cst_27 [1] : vector<8x8xf32> to vector<8xf32>
    %58 = vector.shape_cast %57 : vector<8xf32> to vector<8x1xf32>
    %59 = vector.broadcast %58 : vector<8x1xf32> to vector<8x8xf32>
    %60 = arith.subf %56, %59 : vector<8x8xf32>
    %61 = math.exp %60 : vector<8x8xf32>
    %cst_28 = arith.constant dense<0.000000e+00> : vector<8xf32>
    %62 = vector.multi_reduction <add>, %61, %cst_28 [1] : vector<8x8xf32> to vector<8xf32>
    %63 = vector.shape_cast %62 : vector<8xf32> to vector<8x1xf32>
    %64 = tpu.reciprocal %63 {approx = true} : vector<8x1xf32> -> vector<8x1xf32>
    %65 = vector.broadcast %64 : vector<8x1xf32> to vector<8x8xf32>
    %66 = arith.mulf %61, %65 : vector<8x8xf32>
    %cst_29 = arith.constant dense<0.000000e+00> : vector<8x8xf32>
    %67 = tpu.matmul %66, %55, %cst_29 {dimension_numbers = #tpu.dot_dimension_numbers<[1], [0], [0], [1], [0, 0, 1, 1], [], []>} : vector<8x8xf32>, vector<8x8xf32>, vector<8x8xf32> -> vector<8x8xf32>
    %c0_30 = arith.constant 0 : index
    %c0_31 = arith.constant 0 : index
    %68 = vector.load %arg11[%c0_30, %c0_31] : memref<8x32xf32, #tpu.memory_space<vmem>>, vector<8x8xf32>
    tpu.vector_store %arg11[%c0_30, %c0_31], %67 {strides = array<i32>} : memref<8x32xf32, #tpu.memory_space<vmem>>, vector<8x8xf32>,
    %69 = vector.extract_strided_slice %52 {offsets = [0, 8], sizes = [8, 8], strides = [1, 1]} : vector<8x32xf32> to vector<8x8xf32>
    %70 = vector.extract_strided_slice %43 {offsets = [0, 8], sizes = [8, 8], strides = [1, 1]} : vector<8x32xf32> to vector<8x8xf32>
    %71 = vector.extract_strided_slice %50 {offsets = [0, 8], sizes = [8, 8], strides = [1, 1]} : vector<8x32xf32> to vector<8x8xf32>
    %cst_32 = arith.constant dense<0.000000e+00> : vector<8x8xf32>
    %72 = tpu.matmul %69, %70, %cst_32 {dimension_numbers = #tpu.dot_dimension_numbers<[1], [1], [0], [0], [0, 0, 1, 0], [], []>} : vector<8x8xf32>, vector<8x8xf32>, vector<8x8xf32> -> vector<8x8xf32>
    %cst_33 = arith.constant dense<0xFF800000> : vector<8xf32>
    %73 = vector.multi_reduction <maximumf>, %72, %cst_33 [1] : vector<8x8xf32> to vector<8xf32>
    %74 = vector.shape_cast %73 : vector<8xf32> to vector<8x1xf32>
    %75 = vector.broadcast %74 : vector<8x1xf32> to vector<8x8xf32>
    %76 = arith.subf %72, %75 : vector<8x8xf32>
    %77 = math.exp %76 : vector<8x8xf32>
    %cst_34 = arith.constant dense<0.000000e+00> : vector<8xf32>
    %78 = vector.multi_reduction <add>, %77, %cst_34 [1] : vector<8x8xf32> to vector<8xf32>
    %79 = vector.shape_cast %78 : vector<8xf32> to vector<8x1xf32>
    %80 = tpu.reciprocal %79 {approx = true} : vector<8x1xf32> -> vector<8x1xf32>
    %81 = vector.broadcast %80 : vector<8x1xf32> to vector<8x8xf32>
    %82 = arith.mulf %77, %81 : vector<8x8xf32>
    %cst_35 = arith.constant dense<0.000000e+00> : vector<8x8xf32>
    %83 = tpu.matmul %82, %71, %cst_35 {dimension_numbers = #tpu.dot_dimension_numbers<[1], [0], [0], [1], [0, 0, 1, 1], [], []>} : vector<8x8xf32>, vector<8x8xf32>, vector<8x8xf32> -> vector<8x8xf32>
    %c0_36 = arith.constant 0 : index
    %c8 = arith.constant 8 : index
    %84 = vector.load %arg11[%c0_36, %c8] : memref<8x32xf32, #tpu.memory_space<vmem>>, vector<8x8xf32>
    tpu.vector_store %arg11[%c0_36, %c8], %83 {strides = array<i32>} : memref<8x32xf32, #tpu.memory_space<vmem>>, vector<8x8xf32>,
    %85 = vector.extract_strided_slice %52 {offsets = [0, 16], sizes = [8, 8], strides = [1, 1]} : vector<8x32xf32> to vector<8x8xf32>
    %86 = vector.extract_strided_slice %43 {offsets = [0, 16], sizes = [8, 8], strides = [1, 1]} : vector<8x32xf32> to vector<8x8xf32>
    %87 = vector.extract_strided_slice %50 {offsets = [0, 16], sizes = [8, 8], strides = [1, 1]} : vector<8x32xf32> to vector<8x8xf32>
    %cst_37 = arith.constant dense<0.000000e+00> : vector<8x8xf32>
    %88 = tpu.matmul %85, %86, %cst_37 {dimension_numbers = #tpu.dot_dimension_numbers<[1], [1], [0], [0], [0, 0, 1, 0], [], []>} : vector<8x8xf32>, vector<8x8xf32>, vector<8x8xf32> -> vector<8x8xf32>
    %cst_38 = arith.constant dense<0xFF800000> : vector<8xf32>
    %89 = vector.multi_reduction <maximumf>, %88, %cst_38 [1] : vector<8x8xf32> to vector<8xf32>
    %90 = vector.shape_cast %89 : vector<8xf32> to vector<8x1xf32>
    %91 = vector.broadcast %90 : vector<8x1xf32> to vector<8x8xf32>
    %92 = arith.subf %88, %91 : vector<8x8xf32>
    %93 = math.exp %92 : vector<8x8xf32>
    %cst_39 = arith.constant dense<0.000000e+00> : vector<8xf32>
    %94 = vector.multi_reduction <add>, %93, %cst_39 [1] : vector<8x8xf32> to vector<8xf32>
    %95 = vector.shape_cast %94 : vector<8xf32> to vector<8x1xf32>
    %96 = tpu.reciprocal %95 {approx = true} : vector<8x1xf32> -> vector<8x1xf32>
    %97 = vector.broadcast %96 : vector<8x1xf32> to vector<8x8xf32>
    %98 = arith.mulf %93, %97 : vector<8x8xf32>
    %cst_40 = arith.constant dense<0.000000e+00> : vector<8x8xf32>
    %99 = tpu.matmul %98, %87, %cst_40 {dimension_numbers = #tpu.dot_dimension_numbers<[1], [0], [0], [1], [0, 0, 1, 1], [], []>} : vector<8x8xf32>, vector<8x8xf32>, vector<8x8xf32> -> vector<8x8xf32>
    %c0_41 = arith.constant 0 : index
    %c16 = arith.constant 16 : index
    %100 = vector.load %arg11[%c0_41, %c16] : memref<8x32xf32, #tpu.memory_space<vmem>>, vector<8x8xf32>
    tpu.vector_store %arg11[%c0_41, %c16], %99 {strides = array<i32>} : memref<8x32xf32, #tpu.memory_space<vmem>>, vector<8x8xf32>,
    %101 = vector.extract_strided_slice %52 {offsets = [0, 24], sizes = [8, 8], strides = [1, 1]} : vector<8x32xf32> to vector<8x8xf32>
    %102 = vector.extract_strided_slice %43 {offsets = [0, 24], sizes = [8, 8], strides = [1, 1]} : vector<8x32xf32> to vector<8x8xf32>
    %103 = vector.extract_strided_slice %50 {offsets = [0, 24], sizes = [8, 8], strides = [1, 1]} : vector<8x32xf32> to vector<8x8xf32>
    %cst_42 = arith.constant dense<0.000000e+00> : vector<8x8xf32>
    %104 = tpu.matmul %101, %102, %cst_42 {dimension_numbers = #tpu.dot_dimension_numbers<[1], [1], [0], [0], [0, 0, 1, 0], [], []>} : vector<8x8xf32>, vector<8x8xf32>, vector<8x8xf32> -> vector<8x8xf32>
    %cst_43 = arith.constant dense<0xFF800000> : vector<8xf32>
    %105 = vector.multi_reduction <maximumf>, %104, %cst_43 [1] : vector<8x8xf32> to vector<8xf32>
    %106 = vector.shape_cast %105 : vector<8xf32> to vector<8x1xf32>
    %107 = vector.broadcast %106 : vector<8x1xf32> to vector<8x8xf32>
    %108 = arith.subf %104, %107 : vector<8x8xf32>
    %109 = math.exp %108 : vector<8x8xf32>
    %cst_44 = arith.constant dense<0.000000e+00> : vector<8xf32>
    %110 = vector.multi_reduction <add>, %109, %cst_44 [1] : vector<8x8xf32> to vector<8xf32>
    %111 = vector.shape_cast %110 : vector<8xf32> to vector<8x1xf32>
    %112 = tpu.reciprocal %111 {approx = true} : vector<8x1xf32> -> vector<8x1xf32>
    %113 = vector.broadcast %112 : vector<8x1xf32> to vector<8x8xf32>
    %114 = arith.mulf %109, %113 : vector<8x8xf32>
    %cst_45 = arith.constant dense<0.000000e+00> : vector<8x8xf32>
    %115 = tpu.matmul %114, %103, %cst_45 {dimension_numbers = #tpu.dot_dimension_numbers<[1], [0], [0], [1], [0, 0, 1, 1], [], []>} : vector<8x8xf32>, vector<8x8xf32>, vector<8x8xf32> -> vector<8x8xf32>
    %c0_46 = arith.constant 0 : index
    %c24 = arith.constant 24 : index
    %116 = vector.load %arg11[%c0_46, %c24] : memref<8x32xf32, #tpu.memory_space<vmem>>, vector<8x8xf32>
    tpu.vector_store %arg11[%c0_46, %c24], %115 {strides = array<i32>} : memref<8x32xf32, #tpu.memory_space<vmem>>, vector<8x8xf32>,
    %c0_47 = arith.constant 0 : index
    %c0_48 = arith.constant 0 : index
    %117 = vector.load %arg11[%c0_47, %c0_48] : memref<8x32xf32, #tpu.memory_space<vmem>>, vector<8x32xf32>
    %c0_49 = arith.constant 0 : index
    %c0_50 = arith.constant 0 : index
    %c0_51 = arith.constant 0 : index
    %118 = vector.load %arg10[%c0_49, %c0_50, %c0_51] : memref<1x8x32xf32, #tpu.memory_space<vmem>>, vector<1x8x32xf32>
    %119 = vector.shape_cast %118 : vector<1x8x32xf32> to vector<8x32xf32>
    %120 = vector.shape_cast %117 : vector<8x32xf32> to vector<1x8x32xf32>
    tpu.vector_store %arg10[%c0_49, %c0_50, %c0_51], %120 {strides = array<i32>} : memref<1x8x32xf32, #tpu.memory_space<vmem>>, vector<1x8x32xf32>,
    return
  }
  func.func @transform_0(%arg0: i32) -> (i32, i32, i32) {
    %c0_i32 = arith.constant 0 : i32
    %c0_i32_0 = arith.constant 0 : i32
    %c0_i32_1 = arith.constant 0 : i32
    return %arg0, %c0_i32, %c0_i32_0 : i32, i32, i32
  }
  func.func @transform_1(%arg0: i32) -> (i32, i32) {
    %c0_i32 = arith.constant 0 : i32
    %c0_i32_0 = arith.constant 0 : i32
    %c0_i32_1 = arith.constant 0 : i32
    return %c0_i32, %c0_i32_0 : i32, i32
  }
  func.func @transform_2(%arg0: i32) -> (i32, i32) {
    %c0_i32 = arith.constant 0 : i32
    %c0_i32_0 = arith.constant 0 : i32
    %c0_i32_1 = arith.constant 0 : i32
    return %c0_i32, %c0_i32_0 : i32, i32
  }
  func.func @transform_3(%arg0: i32) -> (i32, i32) {
    %c0_i32 = arith.constant 0 : i32
    %c0_i32_0 = arith.constant 0 : i32
    %c0_i32_1 = arith.constant 0 : i32
    return %c0_i32, %c0_i32_0 : i32, i32
  }
  func.func @transform_4(%arg0: i32) -> (i32, i32) {
    %c0_i32 = arith.constant 0 : i32
    %c0_i32_0 = arith.constant 0 : i32
    %c0_i32_1 = arith.constant 0 : i32
    return %c0_i32, %c0_i32_0 : i32, i32
  }
  func.func @transform_5(%arg0: i32) -> (i32, i32) {
    %c0_i32 = arith.constant 0 : i32
    %c0_i32_0 = arith.constant 0 : i32
    %c0_i32_1 = arith.constant 0 : i32
    return %c0_i32, %c0_i32_0 : i32, i32
  }
  func.func @transform_6(%arg0: i32) -> (i32, i32) {
    %c0_i32 = arith.constant 0 : i32
    %c0_i32_0 = arith.constant 0 : i32
    %c0_i32_1 = arith.constant 0 : i32
    return %c0_i32, %c0_i32_0 : i32, i32
  }
  func.func @transform_7(%arg0: i32) -> (i32, i32) {
    %c0_i32 = arith.constant 0 : i32
    %c0_i32_0 = arith.constant 0 : i32
    %c0_i32_1 = arith.constant 0 : i32
    return %c0_i32, %c0_i32_0 : i32, i32
  }
  func.func @transform_8(%arg0: i32) -> (i32, i32) {
    %c0_i32 = arith.constant 0 : i32
    %c0_i32_0 = arith.constant 0 : i32
    %c0_i32_1 = arith.constant 0 : i32
    return %c0_i32, %c0_i32_0 : i32, i32
  }
  func.func @transform_9(%arg0: i32) -> (i32, i32, i32) {
    %c0_i32 = arith.constant 0 : i32
    %c0_i32_0 = arith.constant 0 : i32
    %c0_i32_1 = arith.constant 0 : i32
    return %arg0, %c0_i32, %c0_i32_0 : i32, i32, i32
  }
}

</mosaic_0001>

<bundles_post_ra>
// kernel: tpu_custom_call.1
= control target key start
LH: loop header
LB: loop body
LE: loop exit
PB: predicated region body
PF: predicated region fallthrough
CT: control target
= control target key end

     0   :  { %s2338_s0 = inlined_call_operand.hbm [shape: f32[2,8,32], index: 0, kind: input, shape index: {}]   ;;  %s2339_s1 = inlined_call_operand.vmem [shape: f32[1,32], index: 1, kind: input, shape index: {}]   ;;  %s2340_s2 = inlined_call_operand.vmem [shape: f32[1,32], index: 2, kind: input, shape index: {}]   ;;  %s2341_s3 = inlined_call_operand.hbm [shape: f32[32,32], index: 3, kind: input, shape index: {}]   ;;  %s2342_s4 = inlined_call_operand.vmem [shape: f32[1,32], index: 4, kind: input, shape index: {}]   ;;  %s2343_s5 = inlined_call_operand.hbm [shape: f32[32,32], index: 5, kind: input, shape index: {}]   ;;  %s2344_s6 = inlined_call_operand.vmem [shape: f32[1,32], index: 6, kind: input, shape index: {}]   ;;  %s2345_s7 = inlined_call_operand.hbm [shape: f32[32,32], index: 7, kind: input, shape index: {}]   ;;  %s2346_s8 = inlined_call_operand.vmem [shape: f32[1,32], index: 8, kind: input, shape index: {}]   ;;  %s2347_s9 = inlined_call_operand.hbm [shape: f32[2,8,32], index: 9, kind: output, shape index: {}]  }
   0x1   :  { %2354 = sst [smem:[#allocation18_spill]] %s2347_s9 }
   0x2   :  { %14 = vsyncpa [#allocation4], 0 }
   0x3   :  { %16 = vsyncpa [#allocation4 + $0x1], 0 }
   0x4   :  { %17 = vsyncpa [#allocation7], 0 }
   0x5   :  { %18 = vsyncpa [#allocation10], 0 }
   0x6   :  { %19 = vsyncpa [#allocation5], 0 }
   0x7   :  { %21 = vsyncpa [#allocation5 + $0x1], 0  ;;  %s1984_s30 = smov 0   ;;  %s1986_s10 = smov 0  }
   0x8   :  { %s1988_s11 = smov 0   ;;  %s1990_s12 = smov 0  }
   0x9 LB: > { %2355 = sst [smem:[#allocation16_spill]] %s1904_s30  ;;  %s2005_s13 = sadd.s32 4294967295, %s1916_s12   ;;  %s1916_s12 = sphi %s1990_s12, %s2379_s12   ;;  %s1912_s11 = sphi %s1988_s11, %s2378_s11   ;;  %s1908_s10 = sphi %s1986_s10, %s2377_s10   ;;  %s1904_s30 = sphi %s1984_s30, %s2376_s30  }
   0xa   : > { %s1462_s14 = sadd.s32 4294967294, %s1916_s12   ;;  %p47_p0 = scmp.ne.s32.totalorder %s1908_s10, %s1904_s30 }
   0xb   : > { %p2348_p1 = scmp.eq.s32.totalorder %s2005_s13, 0  ;;  %p245_p3 = scmp.eq.s32.totalorder %s1462_s14, 1 }
   0xc   : > { %p1463_p5 = scmp.ge.s32.totalorder %s1916_s12, 1  ;;  %p252_p7 = scmp.lt.s32.totalorder %s1916_s12, 3 }
   0xd   : > { %p2014_p4 = por %p2348_p1, %p47_p0  ;;  %p2019_p6 = por %p245_p3, %p47_p0 }
   0xe   : > { %p2024_p8 = pnand %p1463_p5, %p252_p7  ;;  %s1918_s18 = smov [#allocation6]  }
   0xf   : > { %s2356_s15 = scalar_select %p2014_p4, 1, 0 }
  0x10   : > { %s2357_s16 = scalar_select %p2019_p6, 1, 0 }
  0x11   : > { %s2359_s17 = scalar_select %p2024_p8, 1, 0 }
  0x12   : > { %2358 = sst [smem:[#allocation17_spill]] %s2357_s16  ;;  %s270_s19 = sshll.u32 %s1918_s18, 4  ;;  %s2028_s19 = int_to_ptr.vmem [resolvable:$true] %s270_s19 }
  0x13   : > { %p1638_p9 = pneg %p2024_p8  ;;  %s1919_s21 = smov [#allocation8]  }
  0x14   : > { %s286_s22 = sshll.u32 %s1919_s21, 4  ;;  %s1920_s23 = smov [#allocation9]   ;;  %s2039_s22 = int_to_ptr.vmem [resolvable:$true] %s286_s22 }
  0x15   : > { %p2035_p11 = pnand %p1638_p9, %p2348_p1  ;;  %s2041_s24 = sshll.u32 %s1920_s23, 4  ;;  %s303_s24 = int_to_ptr.vmem [resolvable:$true] %s2041_s24 }
  0x16   : > { %s1728_s27 = scalar_lea.hbm %s2341_s3, 512 }
  0x17   : > { %p1729_p12 = scmp.ne.s32.totalorder %s2341_s3, %s1728_s27  ;;  %p2051_p13 = pneg %p2035_p11 }
  0x18   : > { %p1735_p5 = scmp.lt.u32.totalorder %s1728_s27, %s2341_s3 }
  0x19   : > { %p1731_p0 = pnand %p2051_p13, %p1729_p12 }
  0x1b   : > { %p1732_p3 = pneg %p1731_p0 }
  0x1d   : > { %p1737_p7 = pnand %p1735_p5, %p1732_p3 }
  0x1f   : > { %1740 = shalt.err (!%p1737_p7)
}
  0x20   : > { %s1741_s23 = scalar_lea.vmem %s2028_s19, 512  ;;  %p1749_p2 = scmp.lt.s32.totalorder %s2028_s19, %s2028_s19 }
  0x21   : > { %p1742_p9 = scmp.ne.s32.totalorder %s2028_s19, %s1741_s23  ;;  %p1750_p6 = scmp.lt.s32.totalorder %s1741_s23, %s1741_s23 }
  0x23   : > { %p1744_p10 = pnand %p1742_p9, %p2051_p13  ;;  %p1751_p12 = por %p1750_p6, %p1749_p2 }
  0x25   : > { %p1745_p1 = pneg %p1744_p10 }
  0x27   : > { %p1752_p0 = pnand %p1751_p12, %p1745_p1 }
  0x29   : > { %1755 = shalt.err (!%p1752_p0)
}
  0x2a   : > { %s1921_s25 = smov 128   ;;  %s1922_s26 = smov 8  }
  0x2b   : > { %1641 = dma.hbm_to_vmem [thread:$0]  (!%p2035_p11), %s2341_s3, 512, %s2028_s19, [#allocation7], %s1921_s25, %s1921_s25, %s1922_s26  }
  0x2c   : > { %s1756_s21 = scalar_lea.hbm %s2343_s5, 512 }
  0x2d   : > { %p1757_p1 = scmp.ne.s32.totalorder %s2343_s5, %s1756_s21  ;;  %p1763_p10 = scmp.lt.u32.totalorder %s1756_s21, %s2343_s5 }
  0x2f   : > { %p1759_p2 = pnand %p1757_p1, %p2051_p13 }
  0x31   : > { %p1760_p6 = pneg %p1759_p2 }
  0x33   : > { %p1765_p3 = pnand %p1763_p10, %p1760_p6 }
  0x35   : > { %1768 = shalt.err (!%p1765_p3)
}
  0x36   : > { %s1769_s19 = scalar_lea.vmem %s2039_s22, 512  ;;  %p1777_p12 = scmp.lt.s32.totalorder %s2039_s22, %s2039_s22 }
  0x37   : > { %p1770_p5 = scmp.ne.s32.totalorder %s2039_s22, %s1769_s19  ;;  %p1778_p0 = scmp.lt.s32.totalorder %s1769_s19, %s1769_s19 }
  0x39   : > { %p1772_p7 = pnand %p1770_p5, %p2051_p13  ;;  %p1779_p1 = por %p1778_p0, %p1777_p12 }
  0x3b   : > { %p1773_p9 = pneg %p1772_p7 }
  0x3d   : > { %p1780_p2 = pnand %p1779_p1, %p1773_p9 }
  0x3f   : > { %1783 = shalt.err (!%p1780_p2)
}
  0x40   : > { %1644 = dma.hbm_to_vmem [thread:$0]  (!%p2035_p11), %s2343_s5, 512, %s2039_s22, [#allocation7], %s1921_s25, %s1921_s25, %s1922_s26  }
  0x41   : > { %s1784_s28 = scalar_lea.hbm %s2345_s7, 512 }
  0x42   : > { %p1785_p6 = scmp.ne.s32.totalorder %s2345_s7, %s1784_s28  ;;  %p1791_p5 = scmp.lt.u32.totalorder %s1784_s28, %s2345_s7 }
  0x44   : > { %p1787_p10 = pnand %p1785_p6, %p2051_p13 }
  0x46   : > { %p1788_p3 = pneg %p1787_p10 }
  0x48   : > { %p1793_p7 = pnand %p1791_p5, %p1788_p3 }
  0x4a   : > { %1796 = shalt.err (!%p1793_p7)
}
  0x4b   : > { %s1797_s19 = scalar_lea.vmem %s303_s24, 512  ;;  %p1805_p1 = scmp.lt.s32.totalorder %s303_s24, %s303_s24 }
  0x4c   : > { %p1798_p9 = scmp.ne.s32.totalorder %s303_s24, %s1797_s19  ;;  %p1806_p2 = scmp.lt.s32.totalorder %s1797_s19, %s1797_s19 }
  0x4e   : > { %p1800_p12 = pnand %p1798_p9, %p2051_p13  ;;  %p1807_p4 = por %p1806_p2, %p1805_p1 }
  0x50   : > { %p1801_p0 = pneg %p1800_p12 }
  0x52   : > { %p1808_p8 = pnand %p1807_p4, %p1801_p0 }
  0x54   : > { %1811 = shalt.err (!%p1808_p8)
}
  0x55   : > { %1647 = dma.hbm_to_vmem [thread:$0]  (!%p2035_p11), %s2345_s7, 512, %s303_s24, [#allocation10], %s1921_s25, %s1921_s25, %s1922_s26  }
  0x56   : > { %s2124_s14 = sadd.s32 1, %s1916_s12   ;;  %s34_s30 = sadd.s32 1, %s1912_s11 }
  0x57   : > { %s31_s20 = ssub.s32 %s1916_s12, %s2124_s14  ;;  %p41_p8 = scmp.ne.s32.totalorder %s1912_s11, %s1908_s10 }
  0x58   : > { %p32_p4 = scmp.eq.s32.totalorder %s31_s20, 0  ;;  %p42_p13 = scmp.eq.s32.totalorder %s1916_s12, 0 }
  0x59   : > { %p1659_p6 = scmp.lt.s32.totalorder %s1916_s12, 2  ;;  %p2362_p3 = scmp.eq.s32.totalorder %s2005_s13, 1 }
  0x5a   : > { %s2134_s16 = scalar_select %p32_p4, %s1912_s11, %s34_s30  }
  0x5b   : > { %p43_p10 = por %p42_p13, %p41_p8  ;;  %p2138_p5 = por %p2362_p3, %p41_p8 }
  0x5c   : > { %s319_s28 = sand.u32 1, %s1912_s11   ;;  %s1469_s29 = sshll.u32 %s1916_s12, 7 }
  0x5d   : > { %s1468_s24 = sshll.u32 %s319_s28, 3  ;;  %s2147_s18 = scalar_lea.hbm %s2338_s0, %s1469_s29 }
  0x5e   : > { %s323_s21 = scalar_lea.vmem [#allocation3], %s1468_s24  ;;  %p2149_p11 = pnand %p1659_p6, %p43_p10 }
  0x5f   : > { %s330_s23 = sshll.u32 %s323_s21, 4  ;;  %s320_s22 = scalar_lea.sflag [#allocation4], %s319_s28  ;;  %s2153_s23 = int_to_ptr.vmem [resolvable:$true] %s330_s23 }
  0x60   : > { %s1812_s9 = scalar_lea.hbm %s2147_s18, 128  ;;  %p1814_p9 = pneg %p2149_p11 }
  0x61   : > { %p1813_p7 = scmp.ne.s32.totalorder %s2147_s18, %s1812_s9  ;;  %s1817_s29 = scalar_lea.hbm %s2338_s0, 256 }
  0x62   : > { %p1818_p1 = scmp.lt.u32.totalorder %s2147_s18, %s2338_s0  ;;  %p1819_p2 = scmp.lt.u32.totalorder %s1817_s29, %s1812_s9 }
  0x63   : > { %p1815_p12 = pnand %p1814_p9, %p1813_p7  ;;  %p1821_p8 = scmp.lt.u32.totalorder %s1812_s9, %s2147_s18 }
  0x64   : > { %p1820_p4 = por %p1819_p2, %p1818_p1 }
  0x65   : > { %p1816_p0 = pneg %p1815_p12 }
  0x66   : > { %p1822_p13 = por %p1821_p8, %p1820_p4 }
  0x68   : > { %p1823_p6 = pnand %p1822_p13, %p1816_p0 }
  0x6a   : > { %1826 = shalt.err (!%p1823_p6)
}
  0x6b   : > { %s1827_s28 = scalar_lea.vmem %s2153_s23, 128  ;;  %s1923_s26 = smov [#allocation3]  }
  0x6c   : > { %p1828_p10 = scmp.ne.s32.totalorder %s2153_s23, %s1827_s28  ;;  %s1832_s21 = sshll.u32 %s1923_s26, 4  ;;  %s1833_s21 = int_to_ptr.vmem [resolvable:$false] %s1832_s21 }
  0x6d   : > { %s1834_s20 = scalar_lea.vmem %s1833_s21, 256  ;;  %p1835_p12 = scmp.lt.s32.totalorder %s2153_s23, %s1833_s21 }
  0x6e   : > { %p1830_p3 = pnand %p1828_p10, %p1814_p9  ;;  %p1836_p1 = scmp.lt.s32.totalorder %s1834_s20, %s1827_s28 }
  0x70   : > { %p1831_p7 = pneg %p1830_p3  ;;  %p1837_p2 = por %p1836_p1, %p1835_p12 }
  0x72   : > { %p1838_p4 = pnand %p1837_p2, %p1831_p7 }
  0x74   : > { %1841 = shalt.err (!%p1838_p4)
}
  0x75   : > { %1651 = dma.hbm_to_vmem [thread:$0]  (!%p2149_p11), %s2147_s18, 128, %s2153_s23, %s320_s22  }
  0x76   : > { %p2365_p0 = scmp.ne.s32.totalorder %s2359_s17, 0 }
  0x77   : > { %s2183_s9 = sand.u32 (!%p2365_p0), 1, %s1908_s10   ;;  %p2366_p9 = scmp.ne.s32.totalorder (!%p2365_p0), %s2356_s15, 0 }
  0x78   : > { %339 = sbr.rel (%p2365_p0) target bundleno = 1714 (0x6b2), region = 56  ;;  %s1471_s30 = sshll.u32 (!%p2365_p0), %s2183_s9, 3 }
  0x79   : > { %s342_s29 = scalar_lea.sflag (!%p2365_p0), [#allocation4], %s2183_s9  ;;  %s345_s24 = scalar_lea.vmem (!%p2365_p0), [#allocation3], %s1471_s30 }
  0x7f   : > { %1887 = dma.done.wait (%p2366_p9), %s342_s29, 128  }
  0x80   : > { %1889 = vsyncadd (%p2366_p9), %s342_s29, 4294967168  ;;  %p2367_p11 = scmp.eq.s32.totalorder %s2005_s13, 0 }
  0x82   : > { %1891 = dma.done.wait (%p2367_p11), [#allocation7], 1024   ;;  %p2368_p8 = pmov %p2367_p11 }
  0x84   : > { %1893 = vsyncadd (%p2368_p8), [#allocation7], 4294966272  ;;  %p2369_p13 = pmov %p2368_p8 }
  0x85   : > { %p2370_p6 = pmov %p2368_p8 }
  0x86   : > { %1895 = dma.done.wait (%p2369_p13), [#allocation10], 512  }
  0x87   : > { %1897 = vsyncadd (%p2370_p6), [#allocation10], 4294966784  ;;  %vm393_vm0 = vcmask 261120   ;;  %v392_v0 = vld [vmem:[%s345_s24] sm:$0xff]  ;;  %v424_v7 = vld [vmem:[#allocation6] sm:$0xff]  ;;  %v1924_v10 = vmov 0.0|0.0  }
  0x88   : > { %v394_v1 = vsel %vm393_vm0, %v392_v0, 0.0  ;;  %v425_v8 = vld [vmem:[#allocation6 + $0x8] sm:$0xff]  ;;  %v508_v9 = vld [vmem:[#allocation8] sm:$0xff]  ;;  %1604 = vmatprep.subr.bf16.mxu0 %v1924_v10  ;;  %1610 = vmatprep.subr.bf16.mxu1 %v1924_v10  ;;  %v426_v13 = vld [vmem:[#allocation6 + $0x10] sm:$0xff]  ;;  %vm1925_vm1 = vmmov 0   ;;  %v1926_v18 = vmov 0.0  }
  0x89   : > { %395 = vadd.xlane.f32.xlu0 %v394_v1  ;;  %v1605_v11 = vpack.c.bf16 %v425_v8, %v424_v7  ;;  %v509_v12 = vld [vmem:[#allocation8 + $0x8] sm:$0xff]  ;;  %v427_v14 = vld [vmem:[#allocation6 + $0x18] sm:$0xff]  ;;  %v510_v16 = vld [vmem:[#allocation8 + $0x10] sm:$0xff]  ;;  %1539 = vmatprep.mubr.msk.f32.mxu0 %vm1925_vm1, %v1926_v18  ;;  %vm671_vm2 = vcmask 64512   ;;  %s1927_s26 = smov 112   ;;  %s1928_s21 = smov 120  }
  0x8a   : > { %v1611_v15 = vpack.c.bf16 %v509_v12, %v508_v9  ;;  %v511_v17 = vld [vmem:[#allocation8 + $0x18] sm:$0xff]  ;;  %1550 = vmatprep.mubr.msk.f32.mxu1 %vm1925_vm1, %v1926_v18  ;;  %v1608_v19 = vpack.c.bf16 %v427_v14, %v426_v13  ;;  %v1476_v25 = vld [vmem:[%s2339_s1] ss:$0 sm:$0xff]  ;;  %v589_v27 = vld [vmem:[#allocation9] sm:$0xff]  ;;  %s1929_s24 = smov 104   ;;  %s1930_s15 = smov 8  }
  0x8b   : > { %1606 = vmatpush3.bf16.msra.mxu0 %v1605_v11  ;;  %v1614_v20 = vpack.c.bf16 %v511_v17, %v510_v16  ;;  %v590_v28 = vld [vmem:[#allocation9 + $0x8] sm:$0xff]  ;;  %v591_v33 = vld [vmem:[#allocation9 + $0x10] sm:$0xff]  ;;  %v592_v34 = vld [vmem:[#allocation9 + $0x18] sm:$0xff]  ;;  %s1931_s17 = smov 16   ;;  %s1932_s18 = smov 24   ;;  %vm1003_vm3 = vcmask 130112  }
  0x8c   : > { %1612 = vmatpush3.bf16.msra.mxu1 %v1611_v15  ;;  %1607 = vmatprep.subr.bf16.mxu0 %v1924_v10  ;;  %v1477_v29 = vld [vmem:[%s2340_s2] ss:$0 sm:$0xff]  ;;  %v1617_v31 = vpack.c.bf16 %v590_v28, %v589_v27  ;;  %v1620_v35 = vpack.c.bf16 %v592_v34, %v591_v33  ;;  %vm1174_vm4 = vcmask 195712   ;;  %vm1345_vm5 = vcmask 261312   ;;  %s1497_s23 = sshll.u32 %s2005_s13, 7  ;;  %s391_s19 = scalar_lea.vmem [#allocation11], %s1471_s30 }
  0x8d   : > { %1613 = vmatprep.subr.bf16.mxu1 %v1924_v10  ;;  %v1478_v36 = vld [vmem:[%s2342_s4] ss:$0 sm:$0xff]  ;;  %s1363_s22 = sshll.u32 %s391_s19, 4  ;;  %s1350_s20 = scalar_lea.sflag [#allocation5], %s2183_s9  ;;  %s2295_s22 = int_to_ptr.vmem [resolvable:$true] %s1363_s22 }
  0x8e   : > { %v1480_v37 = vld [vmem:[%s2344_s6] ss:$0 sm:$0xff]  ;;  %s1842_s29 = scalar_lea.vmem %s2295_s22, 128  ;;  %s1933_s13 = smov [#allocation11]  }
  0x8f   : > { %1609 = vmatpush3.bf16.msra.mxu0 %v1608_v19  ;;  %v1482_v45 = vld [vmem:[%s2346_s8] ss:$0 sm:$0xff]  ;;  %p1843_p10 = scmp.ne.s32.totalorder %s2295_s22, %s1842_s29  ;;  %s1846_s30 = sshll.u32 %s1933_s13, 4  ;;  %s1847_s30 = int_to_ptr.vmem [resolvable:$false] %s1846_s30 }
  0x90   : > { %1615 = vmatpush3.bf16.msra.mxu1 %v1614_v20  ;;  %1616 = vmatprep.subr.bf16.mxu0 %v1924_v10  ;;  %p1849_p12 = scmp.lt.s32.totalorder %s2295_s22, %s1847_s30 }
  0x91   : > { %1564 = vmatprep.subr.mxu1 %v1926_v18  ;;  %p1844_p3 = pnand %p1843_p10, %p2138_p5 }
  0x93   : > { %p1845_p7 = pneg %p1844_p3 }
 0x116   : > { %v396_v2 = vpop.xlane.xlu0 %395 }
 0x117   : > { %v398_v3 = vmul.f32 0.03125, %v396_v2 }
 0x119   : > { %v399_v4 = vsub.f32 %v392_v0, %v398_v3 }
 0x11b   : > { %v400_v5 = vmul.f32 %v399_v4, %v399_v4 }
 0x11d   : > { %v401_v6 = vsel %vm393_vm0, %v400_v5, 0.0 }
 0x11e   : > { %402 = vadd.xlane.f32.xlu0 %v401_v6 }
 0x1ab   : > { %v403_v21 = vpop.xlane.xlu0 %402 }
 0x1ac   : > { %v404_v22 = vmul.f32 0.03125, %v403_v21 }
 0x1ae   : > { %v405_v23 = vadd.f32 1e-05, %v404_v22 }
 0x1b0   : > { %1710 = vrsqrt.f32 %v405_v23 }
 0x1ba   : > { %v1711_v24 = vpop.eup %1710 }
 0x1bb   : > { %v407_v26 = vmul.f32 %v1711_v24, %v399_v4 }
 0x1bd   : > { %v415_v30 = vmul.f32 %v1476_v25, %v407_v26 }
 0x1bf   : > { %v423_v32 = vadd.f32 %v1477_v29, %v415_v30 }
 0x1c1   : > { %1540 = vmatmul.mubr.msk.f32.vlgmr.msra.gmra.mrb[0].mxu0 %vm393_vm0, %v423_v32  ;;  %1551 = vmatmul.mubr.msk.f32.vlgmr.msra.gmra.mrb[0].mxu1 %vm393_vm0, %v423_v32 }
 0x1c2   : > { %1618 = vmatpush3.bf16.msra.mxu0 %v1617_v31  ;;  %1561 = vmatprep.mubr.msk.f32.mxu0 %vm1925_vm1, %v1926_v18 }
 0x1c3   : > { %1619 = vmatprep.subr.bf16.mxu0 %v1924_v10  ;;  %1566 = vmatprep.mubr.msk.f32.mxu1 %vm1925_vm1, %v1926_v18 }
 0x1c6   : > { %1621 = vmatpush3.bf16.msra.mxu0 %v1620_v35 }
 0x1c7   : > { %1574 = vmatprep.subr.mxu0 %v1926_v18 }
 0x1c9   : > { %1562 = vmatmul.mubr.msk.f32.vlgmr.msra.gmra.mrb[2].mxu0 %vm393_vm0, %v423_v32 }
 0x1ca   : > { %1576 = vmatprep.mubr.msk.f32.mxu0 %vm1925_vm1, %v1926_v18 }
 0x294   : > { %v504_v38 = vpop.f32.mrb[0].mxu0  ;;  %v585_v39 = vpop.f32.mrb[0].mxu1 }
 0x295   : > { %v505_v40 = vadd.f32 %v1478_v36, %v504_v38  ;;  %v586_v41 = vadd.f32 %v1480_v37, %v585_v39  ;;  %v1541_v42 = vpop.f32.mrb[1].mxu0  ;;  %v1552_v43 = vpop.f32.mrb[1].mxu1 }
 0x297   : > { %v670_v44 = vmul.f32 0.35355338, %v505_v40  ;;  %1007 = vrot.lane.b32.xlu0 %v586_v41, %s1927_s26  ;;  %835 = vrot.lane.b32.xlu1 %v586_v41, %s1928_s21 }
 0x298   : > { %1565 = vmatpush3.xpose.msk.msra.mxu1 %vm671_vm2, %v586_v41 }
 0x299   : > { %1569 = vmatprep.subr.mxu1 %v1926_v18 }
 0x29b   : > { %1567 = vmatmul.mubr.msk.f32.vlgmr.msra.gmra.mrb[2].mxu1 %vm671_vm2, %v670_v44  ;;  %1178 = vrot.lane.b32.xlu1 %v586_v41, %s1929_s24 }
 0x29c   : > { %v666_v46 = vpop.f32.mrb[2].mxu0  ;;  %1571 = vmatprep.mubr.msk.f32.mxu1 %vm1925_vm1, %v1926_v18 }
 0x29d   : > { %v2241_v47 = vadd.f32 %v1482_v45, %v666_v46  ;;  %v1563_v48 = vpop.f32.mrb[3].mxu0 }
 0x29f   : > { %1570 = vmatpush3.msra.mxu1 %v2241_v47  ;;  %833 = vrot.lane.b32.xlu1 %v670_v44, %s1928_s21 }
 0x2a0   : > { %1579 = vmatprep.subr.mxu1 %v1926_v18 }
 0x2a3   : > { %1005 = vrot.lane.b32.xlu1 %v670_v44, %s1927_s26 }
 0x2a7   : > { %1176 = vrot.lane.b32.xlu1 %v670_v44, %s1929_s24 }
 0x309   : > { %v836_v49 = vpop.permute.xlu1 %835  ;;  %v1008_v52 = vpop.permute.xlu0 %1007 }
 0x30a   : > { %1575 = vmatpush3.xpose.msk.msra.mxu0 %vm671_vm2, %v836_v49 }
 0x30b   : > { %1584 = vmatprep.subr.mxu0 %v1926_v18 }
 0x30d   : > { %v1179_v50 = vpop.permute.xlu1 %1178 }
 0x311   : > { %v834_v51 = vpop.permute.xlu1 %833 }
 0x312   : > { %1577 = vmatmul.mubr.msk.f32.vlgmr.msra.gmra.mrb[4].mxu0 %vm671_vm2, %v834_v51 }
 0x313   : > { %1585 = vmatpush3.xpose.msk.msra.mxu0 %vm671_vm2, %v1008_v52  ;;  %1586 = vmatprep.mubr.msk.f32.mxu0 %vm1925_vm1, %v1926_v18 }
 0x314   : > { %1594 = vmatprep.subr.mxu0 %v1926_v18 }
 0x315   : > { %v1006_v53 = vpop.permute.xlu1 %1005 }
 0x316   : > { %1587 = vmatmul.mubr.msk.f32.vlgmr.msra.gmra.mrb[6].mxu0 %vm671_vm2, %v1006_v53 }
 0x317   : > { %1595 = vmatpush3.xpose.msk.msra.mxu0 %vm671_vm2, %v1179_v50  ;;  %1596 = vmatprep.mubr.msk.f32.mxu0 %vm1925_vm1, %v1926_v18 }
 0x319   : > { %v1177_v54 = vpop.permute.xlu1 %1176 }
 0x31a   : > { %1597 = vmatmul.mubr.msk.f32.vlgmr.msra.gmra.mrb[8].mxu0 %vm671_vm2, %v1177_v54 }
 0x36e   : > { %v744_v55 = vpop.f32.mrb[2].mxu1 }
 0x36f   : > { %v1568_v56 = vpop.f32.mrb[3].mxu1  ;;  %v748_v57 = vsel %vm671_vm2, %v744_v55, -inf }
 0x370   : > { %749 = vmax.xlane.f32.xlu1 %v748_v57 }
 0x3e5   : > { %v907_v58 = vpop.f32.mrb[4].mxu0 }
 0x3e6   : > { %v1578_v59 = vpop.f32.mrb[5].mxu0  ;;  %v911_v60 = vsel %vm671_vm2, %v907_v58, -inf }
 0x3e7   : > { %912 = vmax.xlane.f32.xlu0 %v911_v60 }
 0x3e9   : > { %v1079_v61 = vpop.f32.mrb[6].mxu0 }
 0x3ea   : > { %v1588_v62 = vpop.f32.mrb[7].mxu0  ;;  %v1083_v63 = vsel %vm671_vm2, %v1079_v61, -inf }
 0x3eb   : > { %1084 = vmax.xlane.f32.xlu1 %v1083_v63 }
 0x3ed   : > { %v1250_v0 = vpop.f32.mrb[8].mxu0 }
 0x3ee   : > { %v1598_v1 = vpop.f32.mrb[9].mxu0  ;;  %v1254_v2 = vsel %vm671_vm2, %v1250_v0, -inf }
 0x3ef   : > { %1255 = vmax.xlane.f32.xlu1 %v1254_v2 }
 0x3fd   : > { %v750_v3 = vpop.xlane.xlu1 %749 }
 0x3fe   : > { %v751_v4 = vsub.f32 %v744_v55, %v750_v3 }
 0x400   : > { %v752_v5 = vmul.f32 1.442695, %v751_v4 }
 0x402   : > { %1712 = vpow2.f32 %v752_v5 }
 0x40c   : > { %v1713_v6 = vpop.eup %1712 }
 0x40d   : > { %v754_v7 = vsel %vm671_vm2, %v1713_v6, 0.0 }
 0x40e   : > { %755 = vadd.xlane.f32.xlu0 %v754_v7 }
 0x474   : > { %v913_v8 = vpop.xlane.xlu0 %912 }
 0x475   : > { %v914_v9 = vsub.f32 %v907_v58, %v913_v8 }
 0x477   : > { %v915_v10 = vmul.f32 1.442695, %v914_v9 }
 0x478   : > { %v1085_v11 = vpop.xlane.xlu1 %1084 }
 0x479   : > { %1714 = vpow2.f32 %v915_v10  ;;  %v1086_v12 = vsub.f32 %v1079_v61, %v1085_v11 }
 0x47b   : > { %v1087_v13 = vmul.f32 1.442695, %v1086_v12 }
 0x47c   : > { %v1256_v20 = vpop.xlane.xlu1 %1255 }
 0x47d   : > { %1716 = vpow2.f32 %v1087_v13  ;;  %v1257_v21 = vsub.f32 %v1250_v0, %v1256_v20 }
 0x47f   : > { %v1258_v24 = vmul.f32 1.442695, %v1257_v21 }
 0x483   : > { %v1715_v14 = vpop.eup %1714 }
 0x484   : > { %v917_v15 = vsel %vm671_vm2, %v1715_v14, 0.0 }
 0x485   : > { %918 = vadd.xlane.f32.xlu1 %v917_v15 }
 0x487   : > { %v1717_v16 = vpop.eup %1716 }
 0x488   : > { %v1089_v17 = vsel %vm671_vm2, %v1717_v16, 0.0 }
 0x489   : > { %1090 = vadd.xlane.f32.xlu0 %v1089_v17 }
 0x496   : > { %1094 = vrot.lane.b32.xlu1 %v2241_v47, %s1927_s26  ;;  %s2371_s26 = sld [smem:[#allocation18_spill]] }
 0x49b   : > { %v756_v19 = vpop.xlane.xlu0 %755 }
 0x49c   : > { %1718 = vrcp.f32 %v756_v19 }
 0x49d   : > { %1720 = vpow2.f32 %v1258_v24 }
 0x49f   : > { %923 = vrot.lane.b32.xlu0 %v2241_v47, %s1928_s21  ;;  %s2293_s21 = scalar_lea.hbm %s2371_s26, %s1497_s23 }
 0x4a6   : > { %v1719_v22 = vpop.eup %1718 }
 0x4a7   : > { %v758_v23 = vmul.f32 %v1719_v22, %v1713_v6  ;;  %v1721_v25 = vpop.eup %1720 }
 0x4a8   : > { %v1260_v26 = vsel %vm671_vm2, %v1721_v25, 0.0 }
 0x4a9   : > { %1572 = vmatmul.mubr.msk.f32.vlgmr.msra.gmra.mrb[4].mxu1 %vm671_vm2, %v758_v23 }
 0x4aa   : > { %1581 = vmatprep.mubr.msk.f32.mxu1 %vm1925_vm1, %v1926_v18 }
 0x4ba   : > { %1261 = vadd.xlane.f32.xlu1 %v1260_v26 }
 0x4cb   : > { %1265 = vrot.lane.b32.xlu1 %v2241_v47, %s1929_s24  ;;  %s1848_s24 = scalar_lea.vmem %s1847_s30, 256 }
 0x4cc   : > { %p1850_p1 = scmp.lt.s32.totalorder %s1848_s24, %s1842_s29 }
 0x4ce   : > { %p1851_p2 = por %p1850_p1, %p1849_p12 }
 0x4d0   : > { %p1852_p4 = pnand %p1851_p2, %p1845_p7 }
 0x512   : > { %v919_v27 = vpop.xlane.xlu1 %918 }
 0x513   : > { %1722 = vrcp.f32 %v919_v27 }
 0x516   : > { %v1091_v28 = vpop.xlane.xlu0 %1090  ;;  %v1095_v32 = vpop.permute.xlu1 %1094 }
 0x517   : > { %1724 = vrcp.f32 %v1091_v28 }
 0x51a   : > { %v924_v29 = vpop.permute.xlu0 %923 }
 0x51b   : > { %1580 = vmatpush3.msra.mxu1 %v924_v29 }
 0x51c   : > { %1589 = vmatprep.subr.mxu1 %v1926_v18 }
 0x51d   : > { %v1723_v30 = vpop.eup %1722 }
 0x51e   : > { %v921_v31 = vmul.f32 %v1723_v30, %v1715_v14 }
 0x520   : > { %1582 = vmatmul.mubr.msk.f32.vlgmr.msra.gmra.mrb[6].mxu1 %vm671_vm2, %v921_v31 }
 0x521   : > { %v1725_v33 = vpop.eup %1724  ;;  %1590 = vmatpush3.msra.mxu1 %v1095_v32  ;;  %1591 = vmatprep.mubr.msk.f32.mxu1 %vm1925_vm1, %v1926_v18 }
 0x522   : > { %v1093_v34 = vmul.f32 %v1725_v33, %v1717_v16  ;;  %1599 = vmatprep.subr.mxu1 %v1926_v18 }
 0x524   : > { %1592 = vmatmul.mubr.msk.f32.vlgmr.msra.gmra.mrb[8].mxu1 %vm671_vm2, %v1093_v34 }
 0x525   : > { %1601 = vmatprep.mubr.msk.f32.mxu1 %vm1925_vm1, %v1926_v18 }
 0x547   : > { %v1262_v35 = vpop.xlane.xlu1 %1261 }
 0x548   : > { %1726 = vrcp.f32 %v1262_v35 }
 0x54b   : > { %v1266_v36 = vpop.permute.xlu1 %1265 }
 0x54c   : > { %1600 = vmatpush3.msra.mxu1 %v1266_v36 }
 0x552   : > { %v1727_v37 = vpop.eup %1726 }
 0x553   : > { %v1264_v38 = vmul.f32 %v1727_v37, %v1721_v25 }
 0x555   : > { %1602 = vmatmul.mubr.msk.f32.vlgmr.msra.gmra.mrb[10].mxu1 %vm671_vm2, %v1264_v38 }
 0x57c   : > { %v828_v39 = vpop.f32.mrb[4].mxu1 }
 0x57d   : > { %832 = vst.msk [vmem:[#allocation2] sm:$0xff] %vm671_vm2, %v828_v39  ;;  %v1573_v40 = vpop.f32.mrb[5].mxu1 }
 0x5f3   : > { %v995_v41 = vpop.f32.mrb[6].mxu1 }
 0x5f4   : > { %1000 = vrot.lane.b32.xlu0 %v995_v41, %s1930_s15  ;;  %v1583_v42 = vpop.f32.mrb[7].mxu1 }
 0x5f7   : > { %v1166_v43 = vpop.f32.mrb[8].mxu1 }
 0x5f8   : > { %1171 = vrot.lane.b32.xlu1 %v1166_v43, %s1931_s17  ;;  %v1593_v18 = vpop.f32.mrb[9].mxu1 }
 0x628   : > { %v1337_v44 = vpop.f32.mrb[10].mxu1 }
 0x629   : > { %1342 = vrot.lane.b32.xlu0 %v1337_v44, %s1932_s18  ;;  %v1603_v45 = vpop.f32.mrb[11].mxu1 }
 0x666   : > { %v1001_v46 = vpop.permute.xlu0 %1000 }
 0x667   : > { %1004 = vst.msk [vmem:[#allocation2] sm:$0xff] %vm1003_vm3, %v1001_v46 }
 0x66a   : > { %v1172_v47 = vpop.permute.xlu1 %1171 }
 0x66b   : > { %1175 = vst.msk [vmem:[#allocation2] sm:$0xff] %vm1174_vm4, %v1172_v47 }
 0x69b   : > { %v1343_v48 = vpop.permute.xlu0 %1342 }
 0x69c   : > { %1346 = vst.msk [vmem:[#allocation2] sm:$0xff] %vm1345_vm5, %v1343_v48 }
 0x6a3   : > { %v1347_v49 = vld [vmem:[#allocation2] sm:$0xff] }
 0x6a4   : > { %1348 = vst.msk [vmem:[%s391_s19] sm:$0xff] %vm393_vm0, %v1347_v49 }
 0x6a5   : > { %1855 = shalt.err (!%p1852_p4)
}
 0x6a6   : > { %s1856_s9 = scalar_lea.hbm %s2293_s21, 128  ;;  %s1860_s18 = scalar_lea.hbm %s2371_s26, 256 }
 0x6a7   : > { %p1857_p0 = scmp.ne.s32.totalorder %s2293_s21, %s1856_s9  ;;  %p1861_p8 = scmp.lt.u32.totalorder %s2293_s21, %s2371_s26 }
 0x6a8   : > { %p1862_p13 = scmp.lt.u32.totalorder %s1860_s18, %s1856_s9  ;;  %p1864_p10 = scmp.lt.u32.totalorder %s1856_s9, %s2293_s21 }
 0x6a9   : > { %p1858_p9 = pnand %p1857_p0, %p2138_p5 }
 0x6aa   : > { %p1863_p6 = por %p1862_p13, %p1861_p8 }
 0x6ab   : > { %p1859_p11 = pneg %p1858_p9 }
 0x6ac   : > { %p1865_p3 = por %p1864_p10, %p1863_p6 }
 0x6ae   : > { %p1866_p7 = pnand %p1865_p3, %p1859_p11 }
 0x6b0   : > { %1869 = shalt.err (!%p1866_p7)
}
 0x6b1   : > { %1636 = dma.vmem_to_hbm [thread:$0]  (%p2138_p5), %s2295_s22, 128, %s2293_s21, %s1350_s20  }
 0x6b2 PF: > { %s2372_s25 = sld [smem:[#allocation16_spill]]  ;;  %s2373_s28 = sld [smem:[#allocation17_spill]] }
 0x6b3   : > { %p2375_p1 = scmp.ge.s32.totalorder %s1916_s12, 2 }
 0x6b8   : > { %s1375_s29 = sand.u32 1, %s2372_s25   ;;  %p2374_p12 = scmp.ne.s32.totalorder %s2373_s28, 0 }
 0x6b9   : > { %s1376_s13 = scalar_lea.sflag [#allocation5], %s1375_s29 }
 0x6ba   : > { %p1653_p2 = pnand %p2375_p1, %p2374_p12 }
 0x6bc   : > { %1899 = dma.done.wait (!%p1653_p2), %s1376_s13, 128  }
 0x6bd   : > { %1901 = vsyncadd (!%p1653_p2), %s1376_s13, 4294967168  ;;  %p24_p4 = scmp.ge.s32.totalorder %s2124_s14, 4   ;;  %s2376_s30 = smov %s1908_s10 }
 0x6be   : > { %s2377_s10 = smov %s1912_s11  ;;  %s2378_s11 = smov %s2134_s16 }
 0x6bf   : > { %s2379_s12 = smov %s2124_s14  ;;  %26 = sbr.rel (!%p24_p4) target bundleno = 9 (0x9), region = 113 }
 0x6c6   :  { %1381 = vsyncpa [#allocation4], 1 }
 0x6c7   :  { %1383 = vsyncpa [#allocation4 + $0x1], 1 }
 0x6c8   :  { %1384 = vsyncpa [#allocation7], 1 }
 0x6c9   :  { %1385 = vsyncpa [#allocation10], 1 }
 0x6ca   :  { %1386 = vsyncpa [#allocation5], 1 }
 0x6cb   :  { %1388 = vsyncpa [#allocation5 + $0x1], 1 }

</bundles_post_ra>
